<compile_context>
chip_gen: v7x
topology: tpu7x:2x2x1
jax: 0.10.0
libtpu: 0.0.40
codegen_flags: <defaults>
</compile_context>

<pallas_src>
import functools

import jax
import jax.numpy as jnp
from jax import lax
from jax.experimental import pallas as pl
from jax.experimental.pallas import tpu as pltpu


LANE = 128
SUBLANE = 8
MAX_ROW_TILE = 4096          # 4096 rows * 128 lanes * 4 B = 2 MiB per input block
NUM_SHARDS = 2               # outer "parallel" axis; both TCs on v7x, ~free on v5e/v6e
PAD_N = -1e30                # (PAD_N + relu(lbd)) / 1.0 -> very negative -> relu == 0
PAD_M = 1.0                  # assumes relu(lbd) << 1e30 (true for this module)


def _round_up(x, m):
    return ((x + m - 1) // m) * m


def _choose_tiling(rows):
    """Return (num_shards, row_tile). row_tile is always a multiple of 8."""
    if rows < 2 * SUBLANE:
        # Too small to split usefully; single shard, one (partially masked) tile.
        return 1, min(MAX_ROW_TILE, _round_up(max(rows, 1), SUBLANE))
    rt = min(MAX_ROW_TILE, _round_up(pl.cdiv(rows, NUM_SHARDS), SUBLANE))
    return NUM_SHARDS, rt


def _lambda2_kernel(lbd_ref, n_ref, m_ref, out_ref, acc_ref, *,
                    valid_rows, row_tile, steps_per_shard, need_mask):
    # Grid: (shard i [parallel], reduction step k [arbitrary]).
    i = pl.program_id(0)
    k = pl.program_id(1)

    @pl.when(k == 0)
    def _():
        acc_ref[...] = jnp.zeros_like(acc_ref)

    lbd = lbd_ref[0]  # already rectified (relu) in the wrapper
    # Pure VPU elementwise work; accumulate into the full-tile VMEM accumulator
    # (independent per-vreg adds -> fully pipelined, no dependence chain).
    obj = jnp.maximum((n_ref[...] + lbd) / m_ref[...], 0.0)

    if need_mask:
        # Ragged tail: zero out rows past the valid row count.  valid_rows is a
        # trace-time Python int; block_start uses the *logical* (unclamped)
        # block position, so duplicated/clamped edge blocks contribute 0.
        block_start = (i * steps_per_shard + k) * row_tile
        row_ids = block_start + lax.broadcasted_iota(
            jnp.int32, (row_tile, LANE), 0)
        obj = jnp.where(row_ids < valid_rows, obj, 0.0)

    acc_ref[...] = acc_ref[...] + obj

    @pl.when(k == pl.num_programs(1) - 1)
    def _():
        # One finalize reduction per shard: collapse (row_tile, 128) accumulator
        # to an (8, 128) lane-dense partial, stored unmasked.
        nblk = row_tile // SUBLANE
        init = acc_ref[pl.ds(0, SUBLANE), :]
        if nblk > 1:
            def body(j, p):
                off = pl.multiple_of(j * SUBLANE, SUBLANE)
                return p + acc_ref[pl.ds(off, SUBLANE), :]
            out_ref[...] = lax.fori_loop(1, nblk, body, init)
        else:
            out_ref[...] = init


def lambda_2_forward(N_i, M_i, lbd):
    """relu((N_i + relu(lbd)) / M_i).sum() as a Pallas TPU kernel."""
    assert N_i.shape == M_i.shape
    total = int(N_i.size)
    if total == 0:
        return jnp.float32(0.0)

    n_flat = N_i.reshape(-1).astype(jnp.float32)
    m_flat = M_i.reshape(-1).astype(jnp.float32)

    # Lane padding only (<= 127 elements, often a no-op). Padded lanes use safe
    # values so they contribute exactly 0 after the relu.
    rem = total % LANE
    if rem:
        pad = LANE - rem
        n_flat = jnp.concatenate(
            [n_flat, jnp.full((pad,), PAD_N, jnp.float32)])
        m_flat = jnp.concatenate(
            [m_flat, jnp.full((pad,), PAD_M, jnp.float32)])

    rows = pl.cdiv(total, LANE)
    n2d = n_flat.reshape(rows, LANE)
    m2d = m_flat.reshape(rows, LANE)

    num_shards, row_tile = _choose_tiling(rows)
    steps_per_shard = pl.cdiv(rows, num_shards * row_tile)
    covered_rows = num_shards * steps_per_shard * row_tile
    need_mask = covered_rows > rows

    # Hoist relu(lbd) out of the kernel body (1-element op in the wrapper).
    lbd_rect = jnp.maximum(lbd.reshape(-1)[:1].astype(jnp.float32), 0.0)

    # Clamp block indices so no block starts past the array; logical coverage
    # (and hence correctness) is handled by the in-kernel row mask.
    last_block = pl.cdiv(rows, row_tile) - 1

    def row_block(i, k):
        return (jnp.minimum(i * steps_per_shard + k, last_block), 0)

    kernel = functools.partial(
        _lambda2_kernel,
        valid_rows=rows,
        row_tile=row_tile,
        steps_per_shard=steps_per_shard,
        need_mask=need_mask,
    )

    partials = pl.pallas_call(
        kernel,
        out_shape=jax.ShapeDtypeStruct((num_shards * SUBLANE, LANE), jnp.float32),
        grid_spec=pltpu.PrefetchScalarGridSpec(
            num_scalar_prefetch=0,
            grid=(num_shards, steps_per_shard),
            in_specs=[
                pl.BlockSpec(memory_space=pltpu.MemorySpace.SMEM),   # lbd (1,)
                pl.BlockSpec((row_tile, LANE), row_block),           # N tile
                pl.BlockSpec((row_tile, LANE), row_block),           # M tile
            ],
            out_specs=pl.BlockSpec((SUBLANE, LANE), lambda i, k: (i, 0)),
            scratch_shapes=[pltpu.VMEM((row_tile, LANE), jnp.float32)],
        ),
        compiler_params=pltpu.CompilerParams(
            dimension_semantics=("parallel", "arbitrary"),
            vmem_limit_bytes=24 * 1024 * 1024,
        ),
    )(lbd_rect, n2d, m2d)

    # Tiny final reduction of the (num_shards*8, 128) partial slab.
    return jnp.sum(partials)


if __name__ == "__main__":
    key = jax.random.PRNGKey(0)
    k_n, k_m, k_n2, k_m2, k_n3, k_m3 = jax.random.split(key, 6)

    # Deterministic parameter init, matching reset_parameter(): lbd = 0.001
    lbd = jnp.full((1,), 0.001, dtype=jnp.float32)

    def ref_fn(N, M, lbd):
        return jnp.sum(jnp.maximum((N + jnp.maximum(lbd[0], 0.0)) / M, 0.0))

    # --- small NCHW test (lane-aligned, 2-shard path, no masking) ---
    B, C, H, W = 2, 4, 16, 16
    N_i = jax.random.normal(k_n, (B, C, H, W), dtype=jnp.float32)
    # Keep M_i away from zero (it is a divisor in the reference module).
    M_i = jax.random.uniform(k_m, (B, C, H, W), dtype=jnp.float32,
                             minval=0.5, maxval=1.5)
    result = jax.block_until_ready(lambda_2_forward(N_i, M_i, lbd))
    ref = ref_fn(N_i, M_i, lbd)
    assert jnp.allclose(result, ref, rtol=1e-5, atol=1e-2), (result, ref)

    # --- misaligned test (exercises lane padding + in-kernel row mask) ---
    N_odd = jax.random.normal(k_n3, (3, 5, 7, 11), dtype=jnp.float32)
    M_odd = jax.random.uniform(k_m3, (3, 5, 7, 11), dtype=jnp.float32,
                               minval=0.5, maxval=1.5)
    result_odd = jax.block_until_ready(lambda_2_forward(N_odd, M_odd, lbd))
    ref_odd = ref_fn(N_odd, M_odd, lbd)
    assert jnp.allclose(result_odd, ref_odd, rtol=1e-5, atol=1e-2), (result_odd, ref_odd)

    # --- larger test exercising the multi-shard / big-tile path ---
    B2, C2, H2, W2 = 8, 16, 64, 64   # 524288 elems -> 4096 rows -> 2 shards
    N_big = jax.random.normal(k_n2, (B2, C2, H2, W2), dtype=jnp.float32)
    M_big = jax.random.uniform(k_m2, (B2, C2, H2, W2), dtype=jnp.float32,
                               minval=0.5, maxval=1.5)
    result_big = jax.block_until_ready(lambda_2_forward(N_big, M_big, lbd))
    ref_big = ref_fn(N_big, M_big, lbd)
    assert jnp.allclose(result_big, ref_big, rtol=1e-4, atol=1e-1), (result_big, ref_big)

    print("KERNEL_OK")
</pallas_src>

<mosaic_0001>
module attributes {stable_mosaic.version = 11 : i64} {
  func.func @_lambda2_kernel(%arg0: i32, %arg1: i32, %arg2: memref<1xf32, #tpu.memory_space<smem>>, %arg3: memref<8x128xf32, #tpu.memory_space<vmem>>, %arg4: memref<8x128xf32, #tpu.memory_space<vmem>>, %arg5: memref<8x128xf32, #tpu.memory_space<vmem>>, %arg6: memref<8x128xf32, #tpu.memory_space<vmem>>) attributes {dimension_semantics = [#tpu.dimension_semantics<parallel>, #tpu.dimension_semantics<arbitrary>], iteration_bounds = array<i64: 2, 1>, scalar_prefetch = 0 : i64, scratch_operands = 1 : i64, tpu.core_type = #tpu.core_type<tc>, window_params = [{transform_indices = @transform_0, window_bounds = array<i64: 1>}, {transform_indices = @transform_1, window_bounds = array<i64: 8, 128>}, {transform_indices = @transform_2, window_bounds = array<i64: 8, 128>}, {transform_indices = @transform_3, window_bounds = array<i64: 8, 128>}]} {
    %c0_i32 = arith.constant 0 : i32
    %0 = arith.cmpi eq, %arg1, %c0_i32 : i32
    %1 = arith.extui %0 : i1 to i32
    %c0_i32_0 = arith.constant 0 : i32
    %2 = arith.cmpi ne, %1, %c0_i32_0 : i32
    scf.if %2 {
      %cst_11 = arith.constant 0.000000e+00 : f32
      %17 = vector.broadcast %cst_11 : f32 to vector<8x128xf32>
      %c0_12 = arith.constant 0 : index
      %c0_13 = arith.constant 0 : index
      %18 = vector.load %arg6[%c0_12, %c0_13] : memref<8x128xf32, #tpu.memory_space<vmem>>, vector<8x128xf32>
      tpu.vector_store %arg6[%c0_12, %c0_13], %17 {strides = array<i32>} : memref<8x128xf32, #tpu.memory_space<vmem>>, vector<8x128xf32>,
    } else {
    }
    %c0 = arith.constant 0 : index
    %3 = memref.load %arg2[%c0] : memref<1xf32, #tpu.memory_space<smem>>
    %c0_1 = arith.constant 0 : index
    %c0_2 = arith.constant 0 : index
    %4 = vector.load %arg3[%c0_1, %c0_2] : memref<8x128xf32, #tpu.memory_space<vmem>>, vector<8x128xf32>
    %5 = vector.broadcast %3 : f32 to vector<8x128xf32>
    %6 = arith.addf %4, %5 : vector<8x128xf32>
    %c0_3 = arith.constant 0 : index
    %c0_4 = arith.constant 0 : index
    %7 = vector.load %arg4[%c0_3, %c0_4] : memref<8x128xf32, #tpu.memory_space<vmem>>, vector<8x128xf32>
    %8 = arith.divf %6, %7 : vector<8x128xf32>
    %cst = arith.constant 0.000000e+00 : f32
    %9 = vector.broadcast %cst : f32 to vector<8x128xf32>
    %10 = arith.maximumf %8, %9 : vector<8x128xf32>
    %c0_5 = arith.constant 0 : index
    %c0_6 = arith.constant 0 : index
    %11 = vector.load %arg6[%c0_5, %c0_6] : memref<8x128xf32, #tpu.memory_space<vmem>>, vector<8x128xf32>
    %12 = arith.addf %11, %10 : vector<8x128xf32>
    %c0_7 = arith.constant 0 : index
    %c0_8 = arith.constant 0 : index
    %13 = vector.load %arg6[%c0_7, %c0_8] : memref<8x128xf32, #tpu.memory_space<vmem>>, vector<8x128xf32>
    tpu.vector_store %arg6[%c0_7, %c0_8], %12 {strides = array<i32>} : memref<8x128xf32, #tpu.memory_space<vmem>>, vector<8x128xf32>,
    %c0_i32_9 = arith.constant 0 : i32
    %14 = arith.cmpi eq, %arg1, %c0_i32_9 : i32
    %15 = arith.extui %14 : i1 to i32
    %c0_i32_10 = arith.constant 0 : i32
    %16 = arith.cmpi ne, %15, %c0_i32_10 : i32
    scf.if %16 {
      %c0_11 = arith.constant 0 : index
      %c0_12 = arith.constant 0 : index
      %17 = vector.load %arg6[%c0_11, %c0_12] : memref<8x128xf32, #tpu.memory_space<vmem>>, vector<8x128xf32>
      %c0_13 = arith.constant 0 : index
      %c0_14 = arith.constant 0 : index
      %18 = vector.load %arg5[%c0_13, %c0_14] : memref<8x128xf32, #tpu.memory_space<vmem>>, vector<8x128xf32>
      tpu.vector_store %arg5[%c0_13, %c0_14], %17 {strides = array<i32>} : memref<8x128xf32, #tpu.memory_space<vmem>>, vector<8x128xf32>,
    } else {
    }
    return
  }
  func.func @transform_0(%arg0: i32, %arg1: i32) -> i32 {
    %c0_i32 = arith.constant 0 : i32
    %c0_i32_0 = arith.constant 0 : i32
    return %c0_i32 : i32
  }
  func.func @transform_1(%arg0: i32, %arg1: i32) -> (i32, i32) {
    %c1_i32 = arith.constant 1 : i32
    %0 = arith.muli %arg0, %c1_i32 : i32
    %1 = arith.addi %0, %arg1 : i32
    %c1_i32_0 = arith.constant 1 : i32
    %2 = arith.minsi %1, %c1_i32_0 : i32
    %c0_i32 = arith.constant 0 : i32
    %c0_i32_1 = arith.constant 0 : i32
    return %2, %c0_i32 : i32, i32
  }
  func.func @transform_2(%arg0: i32, %arg1: i32) -> (i32, i32) {
    %c1_i32 = arith.constant 1 : i32
    %0 = arith.muli %arg0, %c1_i32 : i32
    %1 = arith.addi %0, %arg1 : i32
    %c1_i32_0 = arith.constant 1 : i32
    %2 = arith.minsi %1, %c1_i32_0 : i32
    %c0_i32 = arith.constant 0 : i32
    %c0_i32_1 = arith.constant 0 : i32
    return %2, %c0_i32 : i32, i32
  }
  func.func @transform_3(%arg0: i32, %arg1: i32) -> (i32, i32) {
    %c0_i32 = arith.constant 0 : i32
    %c0_i32_0 = arith.constant 0 : i32
    return %arg0, %c0_i32 : i32, i32
  }
}

</mosaic_0001>

<bundles_post_ra>
// kernel: tpu_custom_call.1
= control target key start
LH: loop header
LB: loop body
LE: loop exit
PB: predicated region body
PF: predicated region fallthrough
CT: control target
= control target key end

     0   :  { %s954_s0 = inlined_call_operand.<no memory space> [shape: f32[1], index: 0, kind: input, shape index: {}]   ;;  %s955_s1 = inlined_call_operand.hbm [shape: f32[16,128], index: 1, kind: input, shape index: {}]   ;;  %s956_s2 = inlined_call_operand.hbm [shape: f32[16,128], index: 2, kind: input, shape index: {}]   ;;  %s957_s3 = inlined_call_operand.hbm [shape: f32[16,128], index: 3, kind: output, shape index: {}]  }
   0x1   :  { %8 = sst [smem:[#allocation3]] %s954_s0 }
   0x2   :  { %9 = vsyncpa [#allocation5], 0 }
   0x3   :  { %11 = vsyncpa [#allocation5 + $0x1], 0 }
   0x4   :  { %12 = vsyncpa [#allocation8], 0 }
   0x5   :  { %14 = vsyncpa [#allocation8 + $0x1], 0 }
   0x6   :  { %15 = vsyncpa [#allocation6], 0 }
   0x7   :  { %17 = vsyncpa [#allocation6 + $0x1], 0  ;;  %s703_s14 = smov 0   ;;  %s705_s15 = smov 0  }
   0x8   :  { %s707_s16 = smov 0   ;;  %s709_s17 = smov 0  }
   0x9   :  { %s711_s18 = smov 0   ;;  %s713_s19 = smov 0  }
   0xa   :  { %s715_s20 = smov 0   ;;  %s717_s0 = smov 0  }
   0xb   :  { %s719_s21 = smov 0  }
   0xc LB: > { %s396_s22 = sadd.s32 4294967295, %s675_s21   ;;  %s397_s23 = sadd.s32 4294967294, %s675_s21   ;;  %s675_s21 = sphi %s719_s21, %s23_s21   ;;  %s671_s0 = sphi %s717_s0, %s982_s0   ;;  %s667_s20 = sphi %s715_s20, %s981_s20   ;;  %s663_s19 = sphi %s713_s19, %s980_s19   ;;  %s659_s18 = sphi %s711_s18, %s979_s18   ;;  %s655_s17 = sphi %s709_s17, %s978_s17   ;;  %s651_s16 = sphi %s707_s16, %s977_s16   ;;  %s647_s15 = sphi %s705_s15, %s976_s15   ;;  %s643_s14 = sphi %s703_s14, %s975_s14  }
   0xd   : > { %s35_s24 = sadd.s32 1, %s671_s0  ;;  %p61_p0 = scmp.lt.s32.totalorder %s671_s0, 1 }
   0xe   : > { %p37_p1 = scmp.ge.s32.totalorder %s35_s24, 2  ;;  %s69_s25 = sadd.s32 1, %s663_s19 }
   0xf   : > { %s752_s26 = scalar_select %p61_p0, %s671_s0, 1 }
  0x10   : > { %s984_s24 = smov (%p37_p1, %s35_s24), 0  ;;  %p76_p2 = scmp.ne.s32.totalorder %s663_s19, %s659_s18 }
  0x11   : > { %p77_p3 = scmp.eq.s32.totalorder %s675_s21, 0  ;;  %p64_p4 = scmp.lt.s32.totalorder %s984_s24, 1 }
  0x12   : > { %p82_p5 = scmp.ne.s32.totalorder %s659_s18, %s655_s17  ;;  %p83_p7 = scmp.eq.s32.totalorder %s396_s22, 0 }
  0x13   : > { %p761_p6 = por %p77_p3, %p76_p2  ;;  %s124_s30 = ssub.s32 %s671_s0, %s984_s24 }
  0x14   : > { %s65_s28 = scalar_select %p64_p4, %s984_s24, 1 }
  0x15   : > { %p766_p8 = por %p83_p7, %p82_p5  ;;  %p125_p9 = scmp.eq.s32.totalorder %s124_s30, 0 }
  0x16   : > { %s66_s4 = ssub.s32 %s752_s26, %s65_s28  ;;  %s127_s5 = sadd.s32 1, %s651_s16 }
  0x17   : > { %s962_s29 = scalar_select %p766_p8, 1, 0 }
  0x18   : > { %p67_p10 = scmp.eq.s32.totalorder %s66_s4, 0  ;;  %p137_p11 = scmp.ne.s32.totalorder %s651_s16, %s647_s15 }
  0x19   : > { %s775_s6 = scalar_select %p125_p9, %s651_s16, %s127_s5  }
  0x1a   : > { %s778_s7 = scalar_select %p67_p10, %s663_s19, %s69_s25  }
  0x1b   : > { %p138_p12 = scmp.eq.s32.totalorder %s396_s22, 1  ;;  %p143_p13 = scmp.ne.s32.totalorder %s647_s15, %s643_s14 }
  0x1c   : > { %p144_p0 = scmp.eq.s32.totalorder %s397_s23, 1  ;;  %p429_p4 = scmp.lt.s32.totalorder %s675_s21, 2 }
  0x1d   : > { %p784_p1 = por %p138_p12, %p137_p11  ;;  %s795_s10 = sand.u32 1, %s663_s19  }
  0x1e   : > { %p789_p3 = por %p144_p0, %p143_p13  ;;  %s401_s11 = sshll.u32 %s752_s26, 7 }
  0x1f   : > { %s963_s8 = scalar_select %p784_p1, 1, 0 }
  0x20   : > { %s964_s9 = scalar_select %p789_p3, 1, 0 }
  0x21   : > { %s958_s12 = sshll.u32 %s795_s10, 3  ;;  %s804_s22 = scalar_lea.hbm %s955_s1, %s401_s11 }
  0x22   : > { %s171_s23 = scalar_lea.vmem [#allocation4], %s958_s12  ;;  %p810_p5 = pnand %p429_p4, %p761_p6 }
  0x23   : > { %s181_s25 = sshll.u32 %s171_s23, 4  ;;  %s168_s30 = scalar_lea.sflag [#allocation5], %s795_s10  ;;  %s814_s25 = int_to_ptr.vmem [resolvable:$true] %s181_s25 }
  0x24   : > { %s505_s4 = scalar_lea.hbm %s804_s22, 128  ;;  %p507_p11 = pneg %p810_p5 }
  0x25   : > { %p506_p10 = scmp.ne.s32.totalorder %s804_s22, %s505_s4  ;;  %s510_s13 = scalar_lea.hbm %s955_s1, 256 }
  0x26   : > { %p511_p6 = scmp.lt.u32.totalorder %s804_s22, %s955_s1  ;;  %p512_p0 = scmp.lt.u32.totalorder %s510_s13, %s505_s4 }
  0x27   : > { %p508_p12 = pnand %p507_p11, %p506_p10  ;;  %p514_p2 = scmp.lt.u32.totalorder %s505_s4, %s804_s22 }
  0x28   : > { %p513_p4 = por %p512_p0, %p511_p6 }
  0x29   : > { %p509_p13 = pneg %p508_p12 }
  0x2a   : > { %p515_p7 = por %p514_p2, %p513_p4 }
  0x2c   : > { %p516_p9 = pnand %p515_p7, %p509_p13 }
  0x2e   : > { %519 = shalt.err (!%p516_p9)
}
  0x2f   : > { %s520_s12 = scalar_lea.vmem %s814_s25, 128  ;;  %s677_s27 = smov [#allocation4]  }
  0x30   : > { %p521_p10 = scmp.ne.s32.totalorder %s814_s25, %s520_s12  ;;  %s525_s5 = sshll.u32 %s677_s27, 4  ;;  %s526_s5 = int_to_ptr.vmem [resolvable:$false] %s525_s5 }
  0x31   : > { %s527_s17 = scalar_lea.vmem %s526_s5, 256  ;;  %p528_p1 = scmp.lt.s32.totalorder %s814_s25, %s526_s5 }
  0x32   : > { %p523_p12 = pnand %p521_p10, %p507_p11  ;;  %p529_p6 = scmp.lt.s32.totalorder %s527_s17, %s520_s12 }
  0x34   : > { %p524_p3 = pneg %p523_p12  ;;  %p530_p0 = por %p529_p6, %p528_p1 }
  0x36   : > { %p531_p2 = pnand %p530_p0, %p524_p3 }
  0x38   : > { %534 = shalt.err (!%p531_p2)
}
  0x39   : > { %421 = dma.hbm_to_vmem [thread:$0]  (!%p810_p5), %s804_s22, 128, %s814_s25, %s168_s30  }
  0x3a   : > { %p966_p7 = scmp.lt.s32.totalorder %s675_s21, 3  ;;  %p967_p9 = scmp.ge.s32.totalorder %s675_s21, 1 }
  0x3b   : > { %s857_s23 = scalar_lea.hbm %s956_s2, %s401_s11  ;;  %s969_s27 = sshll.u32 %s795_s10, 3 }
  0x3c   : > { %p848_p13 = pnand %p967_p9, %p966_p7  ;;  %s192_s5 = scalar_lea.vmem [#allocation7], %s969_s27 }
  0x3d   : > { %s202_s17 = sshll.u32 %s192_s5, 4  ;;  %s189_s22 = scalar_lea.sflag [#allocation8], %s795_s10  ;;  %s203_s17 = int_to_ptr.vmem [resolvable:$true] %s202_s17 }
  0x3e   : > { %s968_s4 = scalar_select %p848_p13, 1, 0 }
  0x3f   : > { %s535_s25 = scalar_lea.hbm %s857_s23, 128  ;;  %s540_s11 = scalar_lea.hbm %s956_s2, 256 }
  0x40   : > { %p536_p1 = scmp.ne.s32.totalorder %s857_s23, %s535_s25  ;;  %p541_p10 = scmp.lt.u32.totalorder %s857_s23, %s956_s2 }
  0x41   : > { %p542_p12 = scmp.lt.u32.totalorder %s540_s11, %s535_s25  ;;  %p544_p0 = scmp.lt.u32.totalorder %s535_s25, %s857_s23 }
  0x42   : > { %p538_p3 = pnand %p536_p1, %p507_p11 }
  0x43   : > { %p543_p6 = por %p542_p12, %p541_p10 }
  0x44   : > { %p539_p4 = pneg %p538_p3 }
  0x45   : > { %p545_p2 = por %p544_p0, %p543_p6 }
  0x47   : > { %p546_p7 = pnand %p545_p2, %p539_p4 }
  0x49   : > { %549 = shalt.err (!%p546_p7)
}
  0x4a   : > { %s550_s10 = scalar_lea.vmem %s203_s17, 128  ;;  %s678_s27 = smov [#allocation7]  }
  0x4b   : > { %p551_p9 = scmp.ne.s32.totalorder %s203_s17, %s550_s10  ;;  %s555_s5 = sshll.u32 %s678_s27, 4  ;;  %s556_s5 = int_to_ptr.vmem [resolvable:$false] %s555_s5 }
  0x4c   : > { %s557_s26 = scalar_lea.vmem %s556_s5, 256  ;;  %p558_p8 = scmp.lt.s32.totalorder %s203_s17, %s556_s5 }
  0x4d   : > { %p553_p1 = pnand %p551_p9, %p507_p11  ;;  %p559_p13 = scmp.lt.s32.totalorder %s557_s26, %s550_s10 }
  0x4f   : > { %p554_p3 = pneg %p553_p1  ;;  %p560_p10 = por %p559_p13, %p558_p8 }
  0x51   : > { %p561_p12 = pnand %p560_p10, %p554_p3 }
  0x53   : > { %564 = shalt.err (!%p561_p12)
}
  0x54   : > { %424 = dma.hbm_to_vmem [thread:$0]  (!%p810_p5), %s857_s23, 128, %s203_s17, %s189_s22  }
  0x55   : > { %p970_p4 = scmp.ne.s32.totalorder %s968_s4, 0 }
  0x56   : > { %s213_s25 = sand.u32 (!%p970_p4), 1, %s659_s18   ;;  %p971_p11 = scmp.ne.s32.totalorder (!%p970_p4), %s962_s29, 0 }
  0x57   : > { %211 = sbr.rel (%p970_p4) target bundleno = 127 (0x7f), region = 32  ;;  %s405_s30 = sshll.u32 (!%p970_p4), %s213_s25, 3 }
  0x58   : > { %s214_s11 = scalar_lea.sflag (!%p970_p4), [#allocation5], %s213_s25  ;;  %s217_s12 = scalar_lea.vmem (!%p970_p4), [#allocation4], %s405_s30 }
  0x5e   : > { %630 = dma.done.wait (%p971_p11), %s214_s11, 128  }
  0x5f   : > { %632 = vsyncadd (%p971_p11), %s214_s11, 4294967168  ;;  %s223_s13 = scalar_lea.sflag [#allocation8], %s213_s25  ;;  %s226_s10 = scalar_lea.vmem [#allocation7], %s405_s30 }
  0x60   : > { %634 = dma.done.wait (%p971_p11), %s223_s13, 128  }
  0x61   : > { %636 = vsyncadd (%p971_p11), %s223_s13, 4294967168  ;;  %s265_s28 = sld [smem:[#allocation3]]  ;;  %v269_v0 = vld [vmem:[%s226_s10] sm:$0xff]  ;;  %s251_s4 = sand.u32 1, %s647_s15   ;;  %v266_v2 = vld [vmem:[%s217_s12] sm:$0xff] }
  0x62   : > { %503 = vrcp.f32 %v269_v0  ;;  %s407_s23 = sshll.u32 %s251_s4, 3  ;;  %s409_s27 = sshll.u32 %s667_s20, 7 }
  0x63   : > { %s253_s17 = scalar_lea.vmem [#allocation9], %s407_s23  ;;  %s899_s26 = scalar_lea.hbm %s957_s3, %s409_s27 }
  0x64   : > { %s295_s22 = sshll.u32 %s253_s17, 4  ;;  %s282_s25 = scalar_lea.sflag [#allocation6], %s251_s4  ;;  %s894_s22 = int_to_ptr.vmem [resolvable:$true] %s295_s22 }
  0x65   : > { %s565_s30 = scalar_lea.vmem %s894_s22, 128  ;;  %p972_p5 = scmp.ne.s32.totalorder %s963_s8, 0 }
  0x66   : > { %p566_p8 = scmp.ne.s32.totalorder %s894_s22, %s565_s30  ;;  %s679_s20 = smov [#allocation9]  }
  0x67   : > { %v267_v1 = vstv %s265_s28  ;;  %s569_s11 = sshll.u32 %s679_s20, 4  ;;  %s570_s11 = int_to_ptr.vmem [resolvable:$false] %s569_s11 }
  0x68   : > { %v268_v3 = vadd.f32 %v267_v1, %v266_v2  ;;  %p567_p13 = pnand %p566_p8, %p972_p5  ;;  %s571_s12 = scalar_lea.vmem %s570_s11, 256 }
  0x69   : > { %p572_p0 = scmp.lt.s32.totalorder %s894_s22, %s570_s11  ;;  %p573_p2 = scmp.lt.s32.totalorder %s571_s12, %s565_s30 }
  0x6a   : > { %p568_p6 = pneg %p567_p13 }
  0x6b   : > { %p574_p7 = por %p573_p2, %p572_p0 }
  0x6c   : > { %v504_v4 = vpop.eup %503 }
  0x6d   : > { %v271_v5 = vmul.f32 %v504_v4, %v268_v3  ;;  %p575_p9 = pnand %p574_p7, %p568_p6 }
  0x6f   : > { %v272_v6 = vmax.f32 %v271_v5, 0.0 }
  0x71   : > { %280 = vst [vmem:[%s253_s17] sm:$0xff] %v272_v6 }
  0x72   : > { %578 = shalt.err (!%p575_p9)
}
  0x73   : > { %s579_s13 = scalar_lea.hbm %s899_s26, 128  ;;  %s583_s4 = scalar_lea.hbm %s957_s3, 256 }
  0x74   : > { %p580_p1 = scmp.ne.s32.totalorder %s899_s26, %s579_s13  ;;  %p584_p12 = scmp.lt.u32.totalorder %s899_s26, %s957_s3 }
  0x75   : > { %p585_p4 = scmp.lt.u32.totalorder %s583_s4, %s579_s13  ;;  %p587_p8 = scmp.lt.u32.totalorder %s579_s13, %s899_s26 }
  0x76   : > { %p581_p3 = pnand %p580_p1, %p972_p5 }
  0x77   : > { %p586_p11 = por %p585_p4, %p584_p12 }
  0x78   : > { %p582_p10 = pneg %p581_p3 }
  0x79   : > { %p588_p13 = por %p587_p8, %p586_p11 }
  0x7b   : > { %p589_p6 = pnand %p588_p13, %p582_p10 }
  0x7d   : > { %592 = shalt.err (!%p589_p6)
}
  0x7e   : > { %416 = dma.vmem_to_hbm [thread:$0]  (%p972_p5), %s894_s22, 128, %s899_s26, %s282_s25  }
  0x7f PF: > { %s307_s27 = sand.u32 1, %s643_s14   ;;  %p973_p0 = scmp.ne.s32.totalorder %s964_s9, 0 }
  0x80   : > { %p974_p2 = scmp.ge.s32.totalorder %s675_s21, 2  ;;  %s308_s29 = scalar_lea.sflag [#allocation6], %s307_s27 }
  0x82   : > { %p426_p7 = pnand %p974_p2, %p973_p0 }
  0x84   : > { %638 = dma.done.wait (!%p426_p7), %s308_s29, 128  }
  0x85   : > { %640 = vsyncadd (!%p426_p7), %s308_s29, 4294967168  ;;  %s23_s21 = sadd.s32 1, %s675_s21   ;;  %s975_s14 = smov %s647_s15 }
  0x86   : > { %p20_p9 = scmp.ge.s32.totalorder %s23_s21, 4   ;;  %s976_s15 = smov %s651_s16 }
  0x87   : > { %s977_s16 = smov %s775_s6  ;;  %s978_s17 = smov %s659_s18 }
  0x88   : > { %s979_s18 = smov %s663_s19  ;;  %s980_s19 = smov %s778_s7 }
  0x89   : > { %s981_s20 = smov %s671_s0  ;;  %s982_s0 = smov %s984_s24 }
  0x8a   :  { %22 = sbr.rel (!%p20_p9) target bundleno = 12 (0xc), region = 98 }
  0x91   :  { %313 = vsyncpa [#allocation5], 1 }
  0x92   :  { %315 = vsyncpa [#allocation5 + $0x1], 1 }
  0x93   :  { %316 = vsyncpa [#allocation8], 1 }
  0x94   :  { %318 = vsyncpa [#allocation8 + $0x1], 1 }
  0x95   :  { %319 = vsyncpa [#allocation6], 1 }
  0x96   :  { %321 = vsyncpa [#allocation6 + $0x1], 1 }

</bundles_post_ra>
